<compile_context>
chip_gen: v7x
topology: tpu7x:2x2x1
jax: 0.10.0
libtpu: 0.0.40
codegen_flags: <defaults>
</compile_context>

<pallas_src>
import jax
import jax.numpy as jnp
from jax.experimental import pallas as pl
from jax.experimental.pallas import tpu as pltpu


def _round_up(x, m):
    return ((x + m - 1) // m) * m


def _attention_kernel(g_ref, x_ref, wg_ref, wx_ref, b_ref, wp_ref, bp_ref,
                      out_ref):
    # g_ref: (Cg, TL)        x_ref / out_ref: (Cx, TL)
    # wg_ref: (F_int, Cg)    wx_ref: (F_int, Cx)
    # b_ref:  (F_int, 1)  (BN-folded bg + bx, added once)
    # wp_ref: (F_int, 1)     bp_ref: (1, 1)
    g = g_ref[...].astype(jnp.float32)
    x = x_ref[...].astype(jnp.float32)
    wg = wg_ref[...]
    wx = wx_ref[...]
    cg = g.shape[0]
    cx = x.shape[0]

    # Fused W_g / W_x projections as outer-product broadcasts on the VPU.
    # (A K=4, N=8 matmul would use <1% of the MXU; VPU slots are idle in this
    #  memory-bound kernel, so this compute is effectively free.)
    acc = wg[:, 0:1] * g[0:1, :]
    for c in range(1, cg):
        acc = acc + wg[:, c:c + 1] * g[c:c + 1, :]
    for c in range(cx):
        acc = acc + wx[:, c:c + 1] * x[c:c + 1, :]
    a = jnp.maximum(acc + b_ref[...], 0.0)                 # ReLU, (F_int, TL)

    # psi logit via cross-sublane reduce (XLU) instead of an N=1 matmul.
    logit = jnp.sum(wp_ref[...] * a, axis=0, keepdims=True) + bp_ref[...]
    psi = jax.nn.sigmoid(logit)                            # (1, TL)

    out_ref[...] = (x * psi).astype(out_ref.dtype)         # lane-dense store


def attention_block_pallas(g3, x3, wgT, wxT, b_fused, wp_col, bp, *, tl):
    """g3: (N, Cg, HWp), x3: (N, Cx, HWp); HWp a multiple of tl."""
    N, Cg, HWp = g3.shape
    _, Cx, _ = x3.shape
    F_int = wgT.shape[0]
    grid = (N, HWp // tl)

    g_spec = pl.BlockSpec((None, Cg, tl), lambda n, t: (n, 0, t))
    x_spec = pl.BlockSpec((None, Cx, tl), lambda n, t: (n, 0, t))
    small = lambda shape: pl.BlockSpec(shape, lambda n, t: (0, 0))

    return pl.pallas_call(
        _attention_kernel,
        out_shape=jax.ShapeDtypeStruct((N, Cx, HWp), x3.dtype),
        grid_spec=pltpu.PrefetchScalarGridSpec(
            num_scalar_prefetch=0,
            grid=grid,
            in_specs=[
                g_spec,                    # g pixels      (N, Cg, HWp)
                x_spec,                    # x pixels      (N, Cx, HWp)
                small((F_int, Cg)),        # W_g^T (BN-folded)
                small((F_int, Cx)),        # W_x^T (BN-folded)
                small((F_int, 1)),         # fused bias bg + bx
                small((F_int, 1)),         # W_psi (BN-folded)
                small((1, 1)),             # b_psi (BN-folded)
            ],
            out_specs=x_spec,
        ),
        compiler_params=pltpu.CompilerParams(
            dimension_semantics=("parallel", "parallel")),
    )(g3, x3, wgT, wxT, b_fused, wp_col, bp)


def _fold_bn(w, b, gamma, beta, rm, rv, eps=1e-5):
    """Fold an eval-mode BatchNorm into a preceding 1x1 conv.

    w: (C_in, C_out), b: (C_out,) ; BN params are (C_out,).
    """
    scale = gamma / jnp.sqrt(rv + eps)
    w_eff = w * scale[None, :]
    b_eff = (b - rm) * scale + beta
    return w_eff, b_eff


def attention_block(g_nchw, x_nchw, params, *, tl_target=1024):
    """Forward pass matching PyTorch Attention_block (BN in eval mode)."""
    N, Cx, H, W = x_nchw.shape
    Cg = g_nchw.shape[1]
    HW = H * W

    # NCHW -> (N, C, H*W): a free reshape (no HBM transpose); H*W goes on the
    # lane axis.
    g3 = g_nchw.reshape(N, Cg, HW)
    x3 = x_nchw.reshape(N, Cx, HW)

    # Fold eval-mode BatchNorms into the 1x1 convs.
    wg, bg = _fold_bn(params["wg"], params["bg"], *params["bn_g"])
    wx, bx = _fold_bn(params["wx"], params["bx"], *params["bn_x"])
    wp, bp = _fold_bn(params["wp"], params["bp"], *params["bn_p"])
    F_int = wg.shape[1]

    wgT = jnp.transpose(wg)                       # (F_int, Cg)
    wxT = jnp.transpose(wx)                       # (F_int, Cx)
    b_fused = (bg + bx).reshape(F_int, 1)         # added once in-kernel
    wp_col = wp.reshape(F_int, 1)
    bp_ = bp.reshape(1, 1)

    # Lane tile: multiple of 128, as large as possible (kernel is HBM-bound,
    # ~0.35us per grid step), capped so the double-buffered g/x/out tiles stay
    # well inside the smallest scoped-VMEM default (v7x: 32 MiB of 64 MiB).
    vmem_budget = 24 * 1024 * 1024
    bytes_per_lane = (Cg + 2 * Cx) * 4 * 2        # 2x for double buffering
    max_tl = max(128, (vmem_budget // bytes_per_lane) // 128 * 128)
    tl = min(_round_up(tl_target, 128), max_tl, _round_up(HW, 128))
    HW_pad = _round_up(HW, tl)

    if HW_pad != HW:                              # masked tail via zero-pad
        pad = ((0, 0), (0, 0), (0, HW_pad - HW))
        g3 = jnp.pad(g3, pad)
        x3 = jnp.pad(x3, pad)

    out3 = attention_block_pallas(g3, x3, wgT, wxT, b_fused, wp_col, bp_,
                                  tl=tl)
    if HW_pad != HW:
        out3 = out3[:, :, :HW]
    return out3.reshape(N, Cx, H, W)


def _reference(g_nchw, x_nchw, params):
    """Pure-JAX reference (same math, no Pallas) for a sanity check."""
    wg, bg = _fold_bn(params["wg"], params["bg"], *params["bn_g"])
    wx, bx = _fold_bn(params["wx"], params["bx"], *params["bn_x"])
    wp, bp = _fold_bn(params["wp"], params["bp"], *params["bn_p"])
    g1 = jnp.einsum("nchw,cf->nfhw", g_nchw, wg) + bg[None, :, None, None]
    x1 = jnp.einsum("nchw,cf->nfhw", x_nchw, wx) + bx[None, :, None, None]
    a = jnp.maximum(g1 + x1, 0.0)
    logit = jnp.einsum("nfhw,fo->nohw", a, wp) + bp[None, :, None, None]
    psi = jax.nn.sigmoid(logit)
    return x_nchw * psi


if __name__ == "__main__":
    # Small shapes consistent with the module: F_g = F_l = 4, F_int = 8.
    N, C, H, W = 2, 4, 16, 16
    F_int = 8

    key = jax.random.PRNGKey(0)
    ks = jax.random.split(key, 12)

    g = jax.random.normal(ks[0], (N, C, H, W), jnp.float32)
    x = jax.random.normal(ks[1], (N, C, H, W), jnp.float32)

    def bn_params(k, c):
        k1, k2, k3, k4 = jax.random.split(k, 4)
        gamma = 1.0 + 0.1 * jax.random.normal(k1, (c,), jnp.float32)
        beta = 0.1 * jax.random.normal(k2, (c,), jnp.float32)
        rm = 0.1 * jax.random.normal(k3, (c,), jnp.float32)
        rv = jnp.abs(1.0 + 0.1 * jax.random.normal(k4, (c,), jnp.float32))
        return (gamma, beta, rm, rv)

    # Conv2d(C_in, C_out, kernel_size=1) weight (C_out, C_in, 1, 1) stored as
    # its (C_in, C_out) matmul form.
    params = {
        "wg": 0.3 * jax.random.normal(ks[2], (C, F_int), jnp.float32),
        "bg": 0.1 * jax.random.normal(ks[3], (F_int,), jnp.float32),
        "wx": 0.3 * jax.random.normal(ks[4], (C, F_int), jnp.float32),
        "bx": 0.1 * jax.random.normal(ks[5], (F_int,), jnp.float32),
        "wp": 0.3 * jax.random.normal(ks[6], (F_int, 1), jnp.float32),
        "bp": 0.1 * jax.random.normal(ks[7], (1,), jnp.float32),
        "bn_g": bn_params(ks[8], F_int),
        "bn_x": bn_params(ks[9], F_int),
        "bn_p": bn_params(ks[10], 1),
    }
    # TODO(synk): BatchNorm2d is folded in eval mode; training-mode batch
    # statistics are not modeled inside the kernel.

    out = attention_block(g, x, params)
    out = jax.block_until_ready(out)

    ref = _reference(g, x, params)
    assert out.shape == (N, C, H, W)
    assert jnp.allclose(out, ref, atol=1e-5, rtol=1e-5)

    print("KERNEL_OK")
</pallas_src>

<mosaic_0001>
module attributes {stable_mosaic.version = 11 : i64} {
  func.func @_attention_kernel(%arg0: i32, %arg1: i32, %arg2: memref<1x4x256xf32, #tpu.memory_space<vmem>>, %arg3: memref<1x4x256xf32, #tpu.memory_space<vmem>>, %arg4: memref<8x4xf32, #tpu.memory_space<vmem>>, %arg5: memref<8x4xf32, #tpu.memory_space<vmem>>, %arg6: memref<8x1xf32, #tpu.memory_space<vmem>>, %arg7: memref<8x1xf32, #tpu.memory_space<vmem>>, %arg8: memref<1x1xf32, #tpu.memory_space<vmem>>, %arg9: memref<1x4x256xf32, #tpu.memory_space<vmem>>) attributes {dimension_semantics = [#tpu.dimension_semantics<parallel>, #tpu.dimension_semantics<parallel>], iteration_bounds = array<i64: 2, 1>, scalar_prefetch = 0 : i64, scratch_operands = 0 : i64, tpu.core_type = #tpu.core_type<tc>, window_params = [{transform_indices = @transform_0, window_bounds = array<i64: 1, 4, 256>}, {transform_indices = @transform_1, window_bounds = array<i64: 1, 4, 256>}, {pipeline_mode = #tpu.pipeline_mode<synchronous>, transform_indices = @transform_2, window_bounds = array<i64: 8, 4>}, {pipeline_mode = #tpu.pipeline_mode<synchronous>, transform_indices = @transform_3, window_bounds = array<i64: 8, 4>}, {pipeline_mode = #tpu.pipeline_mode<synchronous>, transform_indices = @transform_4, window_bounds = array<i64: 8, 1>}, {pipeline_mode = #tpu.pipeline_mode<synchronous>, transform_indices = @transform_5, window_bounds = array<i64: 8, 1>}, {pipeline_mode = #tpu.pipeline_mode<synchronous>, transform_indices = @transform_6, window_bounds = array<i64: 1, 1>}, {transform_indices = @transform_7, window_bounds = array<i64: 1, 4, 256>}]} {
    %c0 = arith.constant 0 : index
    %c0_0 = arith.constant 0 : index
    %c0_1 = arith.constant 0 : index
    %0 = vector.load %arg2[%c0, %c0_0, %c0_1] : memref<1x4x256xf32, #tpu.memory_space<vmem>>, vector<1x4x256xf32>
    %1 = vector.shape_cast %0 : vector<1x4x256xf32> to vector<4x256xf32>
    %c0_2 = arith.constant 0 : index
    %c0_3 = arith.constant 0 : index
    %c0_4 = arith.constant 0 : index
    %2 = vector.load %arg3[%c0_2, %c0_3, %c0_4] : memref<1x4x256xf32, #tpu.memory_space<vmem>>, vector<1x4x256xf32>
    %3 = vector.shape_cast %2 : vector<1x4x256xf32> to vector<4x256xf32>
    %c0_5 = arith.constant 0 : index
    %c0_6 = arith.constant 0 : index
    %4 = vector.load %arg4[%c0_5, %c0_6] : memref<8x4xf32, #tpu.memory_space<vmem>>, vector<8x4xf32>
    %c0_7 = arith.constant 0 : index
    %c0_8 = arith.constant 0 : index
    %5 = vector.load %arg5[%c0_7, %c0_8] : memref<8x4xf32, #tpu.memory_space<vmem>>, vector<8x4xf32>
    %6 = vector.extract_strided_slice %4 {offsets = [0, 0], sizes = [8, 1], strides = [1, 1]} : vector<8x4xf32> to vector<8x1xf32>
    %7 = vector.extract_strided_slice %1 {offsets = [0, 0], sizes = [1, 256], strides = [1, 1]} : vector<4x256xf32> to vector<1x256xf32>
    %8 = vector.broadcast %6 : vector<8x1xf32> to vector<8x256xf32>
    %9 = vector.broadcast %7 : vector<1x256xf32> to vector<8x256xf32>
    %10 = arith.mulf %8, %9 : vector<8x256xf32>
    %11 = vector.extract_strided_slice %4 {offsets = [0, 1], sizes = [8, 1], strides = [1, 1]} : vector<8x4xf32> to vector<8x1xf32>
    %12 = vector.extract_strided_slice %1 {offsets = [1, 0], sizes = [1, 256], strides = [1, 1]} : vector<4x256xf32> to vector<1x256xf32>
    %13 = vector.broadcast %11 : vector<8x1xf32> to vector<8x256xf32>
    %14 = vector.broadcast %12 : vector<1x256xf32> to vector<8x256xf32>
    %15 = arith.mulf %13, %14 : vector<8x256xf32>
    %16 = arith.addf %10, %15 : vector<8x256xf32>
    %17 = vector.extract_strided_slice %4 {offsets = [0, 2], sizes = [8, 1], strides = [1, 1]} : vector<8x4xf32> to vector<8x1xf32>
    %18 = vector.extract_strided_slice %1 {offsets = [2, 0], sizes = [1, 256], strides = [1, 1]} : vector<4x256xf32> to vector<1x256xf32>
    %19 = vector.broadcast %17 : vector<8x1xf32> to vector<8x256xf32>
    %20 = vector.broadcast %18 : vector<1x256xf32> to vector<8x256xf32>
    %21 = arith.mulf %19, %20 : vector<8x256xf32>
    %22 = arith.addf %16, %21 : vector<8x256xf32>
    %23 = vector.extract_strided_slice %4 {offsets = [0, 3], sizes = [8, 1], strides = [1, 1]} : vector<8x4xf32> to vector<8x1xf32>
    %24 = vector.extract_strided_slice %1 {offsets = [3, 0], sizes = [1, 256], strides = [1, 1]} : vector<4x256xf32> to vector<1x256xf32>
    %25 = vector.broadcast %23 : vector<8x1xf32> to vector<8x256xf32>
    %26 = vector.broadcast %24 : vector<1x256xf32> to vector<8x256xf32>
    %27 = arith.mulf %25, %26 : vector<8x256xf32>
    %28 = arith.addf %22, %27 : vector<8x256xf32>
    %29 = vector.extract_strided_slice %5 {offsets = [0, 0], sizes = [8, 1], strides = [1, 1]} : vector<8x4xf32> to vector<8x1xf32>
    %30 = vector.extract_strided_slice %3 {offsets = [0, 0], sizes = [1, 256], strides = [1, 1]} : vector<4x256xf32> to vector<1x256xf32>
    %31 = vector.broadcast %29 : vector<8x1xf32> to vector<8x256xf32>
    %32 = vector.broadcast %30 : vector<1x256xf32> to vector<8x256xf32>
    %33 = arith.mulf %31, %32 : vector<8x256xf32>
    %34 = arith.addf %28, %33 : vector<8x256xf32>
    %35 = vector.extract_strided_slice %5 {offsets = [0, 1], sizes = [8, 1], strides = [1, 1]} : vector<8x4xf32> to vector<8x1xf32>
    %36 = vector.extract_strided_slice %3 {offsets = [1, 0], sizes = [1, 256], strides = [1, 1]} : vector<4x256xf32> to vector<1x256xf32>
    %37 = vector.broadcast %35 : vector<8x1xf32> to vector<8x256xf32>
    %38 = vector.broadcast %36 : vector<1x256xf32> to vector<8x256xf32>
    %39 = arith.mulf %37, %38 : vector<8x256xf32>
    %40 = arith.addf %34, %39 : vector<8x256xf32>
    %41 = vector.extract_strided_slice %5 {offsets = [0, 2], sizes = [8, 1], strides = [1, 1]} : vector<8x4xf32> to vector<8x1xf32>
    %42 = vector.extract_strided_slice %3 {offsets = [2, 0], sizes = [1, 256], strides = [1, 1]} : vector<4x256xf32> to vector<1x256xf32>
    %43 = vector.broadcast %41 : vector<8x1xf32> to vector<8x256xf32>
    %44 = vector.broadcast %42 : vector<1x256xf32> to vector<8x256xf32>
    %45 = arith.mulf %43, %44 : vector<8x256xf32>
    %46 = arith.addf %40, %45 : vector<8x256xf32>
    %47 = vector.extract_strided_slice %5 {offsets = [0, 3], sizes = [8, 1], strides = [1, 1]} : vector<8x4xf32> to vector<8x1xf32>
    %48 = vector.extract_strided_slice %3 {offsets = [3, 0], sizes = [1, 256], strides = [1, 1]} : vector<4x256xf32> to vector<1x256xf32>
    %49 = vector.broadcast %47 : vector<8x1xf32> to vector<8x256xf32>
    %50 = vector.broadcast %48 : vector<1x256xf32> to vector<8x256xf32>
    %51 = arith.mulf %49, %50 : vector<8x256xf32>
    %52 = arith.addf %46, %51 : vector<8x256xf32>
    %c0_9 = arith.constant 0 : index
    %c0_10 = arith.constant 0 : index
    %53 = vector.load %arg6[%c0_9, %c0_10] : memref<8x1xf32, #tpu.memory_space<vmem>>, vector<8x1xf32>
    %54 = vector.broadcast %53 : vector<8x1xf32> to vector<8x256xf32>
    %55 = arith.addf %52, %54 : vector<8x256xf32>
    %cst = arith.constant 0.000000e+00 : f32
    %56 = vector.broadcast %cst : f32 to vector<8x256xf32>
    %57 = arith.maximumf %55, %56 : vector<8x256xf32>
    %c0_11 = arith.constant 0 : index
    %c0_12 = arith.constant 0 : index
    %58 = vector.load %arg7[%c0_11, %c0_12] : memref<8x1xf32, #tpu.memory_space<vmem>>, vector<8x1xf32>
    %59 = vector.broadcast %58 : vector<8x1xf32> to vector<8x256xf32>
    %60 = arith.mulf %59, %57 : vector<8x256xf32>
    %cst_13 = arith.constant dense<0.000000e+00> : vector<256xf32>
    %61 = vector.multi_reduction <add>, %60, %cst_13 [0] : vector<8x256xf32> to vector<256xf32>
    %62 = vector.shape_cast %61 : vector<256xf32> to vector<1x256xf32>
    %c0_14 = arith.constant 0 : index
    %c0_15 = arith.constant 0 : index
    %63 = vector.load %arg8[%c0_14, %c0_15] : memref<1x1xf32, #tpu.memory_space<vmem>>, vector<1x1xf32>
    %64 = vector.broadcast %63 : vector<1x1xf32> to vector<1x256xf32>
    %65 = arith.addf %62, %64 : vector<1x256xf32>
    %66 = arith.negf %65 : vector<1x256xf32>
    %67 = math.exp %66 : vector<1x256xf32>
    %cst_16 = arith.constant 1.000000e+00 : f32
    %68 = vector.broadcast %cst_16 : f32 to vector<1x256xf32>
    %69 = arith.addf %68, %67 : vector<1x256xf32>
    %70 = arith.divf %68, %69 : vector<1x256xf32>
    %71 = vector.broadcast %70 : vector<1x256xf32> to vector<4x256xf32>
    %72 = arith.mulf %3, %71 : vector<4x256xf32>
    %c0_17 = arith.constant 0 : index
    %c0_18 = arith.constant 0 : index
    %c0_19 = arith.constant 0 : index
    %73 = vector.load %arg9[%c0_17, %c0_18, %c0_19] : memref<1x4x256xf32, #tpu.memory_space<vmem>>, vector<1x4x256xf32>
    %74 = vector.shape_cast %73 : vector<1x4x256xf32> to vector<4x256xf32>
    %75 = vector.shape_cast %72 : vector<4x256xf32> to vector<1x4x256xf32>
    tpu.vector_store %arg9[%c0_17, %c0_18, %c0_19], %75 {strides = array<i32>} : memref<1x4x256xf32, #tpu.memory_space<vmem>>, vector<1x4x256xf32>,
    return
  }
  func.func @transform_0(%arg0: i32, %arg1: i32) -> (i32, i32, i32) {
    %c0_i32 = arith.constant 0 : i32
    %c0_i32_0 = arith.constant 0 : i32
    return %arg0, %c0_i32, %arg1 : i32, i32, i32
  }
  func.func @transform_1(%arg0: i32, %arg1: i32) -> (i32, i32, i32) {
    %c0_i32 = arith.constant 0 : i32
    %c0_i32_0 = arith.constant 0 : i32
    return %arg0, %c0_i32, %arg1 : i32, i32, i32
  }
  func.func @transform_2(%arg0: i32, %arg1: i32) -> (i32, i32) {
    %c0_i32 = arith.constant 0 : i32
    %c0_i32_0 = arith.constant 0 : i32
    %c0_i32_1 = arith.constant 0 : i32
    return %c0_i32, %c0_i32_0 : i32, i32
  }
  func.func @transform_3(%arg0: i32, %arg1: i32) -> (i32, i32) {
    %c0_i32 = arith.constant 0 : i32
    %c0_i32_0 = arith.constant 0 : i32
    %c0_i32_1 = arith.constant 0 : i32
    return %c0_i32, %c0_i32_0 : i32, i32
  }
  func.func @transform_4(%arg0: i32, %arg1: i32) -> (i32, i32) {
    %c0_i32 = arith.constant 0 : i32
    %c0_i32_0 = arith.constant 0 : i32
    %c0_i32_1 = arith.constant 0 : i32
    return %c0_i32, %c0_i32_0 : i32, i32
  }
  func.func @transform_5(%arg0: i32, %arg1: i32) -> (i32, i32) {
    %c0_i32 = arith.constant 0 : i32
    %c0_i32_0 = arith.constant 0 : i32
    %c0_i32_1 = arith.constant 0 : i32
    return %c0_i32, %c0_i32_0 : i32, i32
  }
  func.func @transform_6(%arg0: i32, %arg1: i32) -> (i32, i32) {
    %c0_i32 = arith.constant 0 : i32
    %c0_i32_0 = arith.constant 0 : i32
    %c0_i32_1 = arith.constant 0 : i32
    return %c0_i32, %c0_i32_0 : i32, i32
  }
  func.func @transform_7(%arg0: i32, %arg1: i32) -> (i32, i32, i32) {
    %c0_i32 = arith.constant 0 : i32
    %c0_i32_0 = arith.constant 0 : i32
    return %arg0, %c0_i32, %arg1 : i32, i32, i32
  }
}

</mosaic_0001>

<bundles_post_ra>
// kernel: tpu_custom_call.1
= control target key start
LH: loop header
LB: loop body
LE: loop exit
PB: predicated region body
PF: predicated region fallthrough
CT: control target
= control target key end

     0   :  { %s1126_s0 = inlined_call_operand.vmem [shape: f32[2,4,256], index: 0, kind: input, shape index: {}]   ;;  %s1127_s1 = inlined_call_operand.vmem [shape: f32[2,4,256], index: 1, kind: input, shape index: {}]   ;;  %s1128_s2 = inlined_call_operand.vmem [shape: f32[8,4], index: 2, kind: input, shape index: {}]   ;;  %s1129_s3 = inlined_call_operand.vmem [shape: f32[8,4], index: 3, kind: input, shape index: {}]   ;;  %s1130_s4 = inlined_call_operand.vmem [shape: f32[8,1], index: 4, kind: input, shape index: {}]   ;;  %s1131_s5 = inlined_call_operand.vmem [shape: f32[8,1], index: 5, kind: input, shape index: {}]   ;;  %s1132_s6 = inlined_call_operand.<no memory space> [shape: f32[1,1], index: 6, kind: input, shape index: {}]   ;;  %s1133_s7 = inlined_call_operand.hbm [shape: f32[2,4,256], index: 7, kind: output, shape index: {}]  }
   0x1   :  { %v12_v0 = vstv %s1132_s6 }
   0x2   :  { %13 = vst [vmem:[#allocation2] sm:$0x1] %v12_v0 }
   0x3   :  { %14 = vsyncpa [#allocation4], 0 }
   0x4   :  { %16 = vsyncpa [#allocation4 + $0x1], 0  ;;  %s955_s26 = smov 0   ;;  %s957_s27 = smov 0  }
   0x5   :  { %s959_s28 = smov 0   ;;  %s961_s29 = smov 0  }
   0x6   :  { %s963_s30 = smov 0   ;;  %s965_s8 = smov 0  }
   0x7 LB: > { %s731_s6 = sadd.s32 4294967295, %s905_s8   ;;  %s732_s9 = sadd.s32 4294967294, %s905_s8   ;;  %s905_s8 = sphi %s965_s8, %s22_s8   ;;  %s901_s30 = sphi %s963_s30, %s1140_s30   ;;  %s897_s29 = sphi %s961_s29, %s1139_s29   ;;  %s893_s28 = sphi %s959_s28, %s1138_s28   ;;  %s889_s27 = sphi %s957_s27, %s1137_s27   ;;  %s885_s26 = sphi %s955_s26, %s1136_s26  }
   0x8   : > { %s34_s10 = sadd.s32 1, %s901_s30  ;;  %s204_s11 = sadd.s32 1, %s893_s28 }
   0x9   : > { %p36_p0 = scmp.ge.s32.totalorder %s34_s10, 2  ;;  %p214_p1 = scmp.ne.s32.totalorder %s893_s28, %s889_s27 }
   0xa   : > { %p215_p2 = scmp.eq.s32.totalorder %s731_s6, 1  ;;  %p220_p3 = scmp.ne.s32.totalorder %s889_s27, %s885_s26 }
   0xb   : > { %s1142_s10 = smov (%p36_p0, %s34_s10), 0  ;;  %p221_p5 = scmp.eq.s32.totalorder %s732_s9, 1 }
   0xc   : > { %p995_p4 = por %p215_p2, %p214_p1  ;;  %s199_s13 = ssub.s32 %s901_s30, %s1142_s10 }
   0xd   : > { %p735_p6 = scmp.ge.s32.totalorder %s905_s8, 1  ;;  %p202_p7 = scmp.eq.s32.totalorder %s199_s13, 0 }
   0xe   : > { %p1002_p8 = por %p221_p5, %p220_p3  ;;  %p280_p9 = scmp.lt.s32.totalorder %s905_s8, 3 }
   0xf   : > { %s1008_s15 = scalar_select %p202_p7, %s893_s28, %s204_s11  }
  0x10   : > { %p281_p10 = pnand %p735_p6, %p280_p9 }
  0x11   : > { %v348_v1 = vld [vmem:[%s1128_s2] sm:$0xff] (!%p281_p10)  ;;  %v907_v2 = vmov (!%p281_p10), 2   ;;  %v908_v3 = vmov (!%p281_p10), 0   ;;  %v909_v4 = vmov (!%p281_p10), 3   ;;  %v910_v5 = vmov (!%p281_p10), 1   ;;  %p326_p11 = scmp.lt.s32.totalorder (!%p281_p10), %s897_s29, 1 }
  0x12   : > { %284 = sbr.rel (%p281_p10) target bundleno = 233 (0xe9), region = 48  ;;  %812 = vset.pattern.permute.xlu1 (!%p281_p10), %v907_v2  ;;  %810 = vset.pattern.permute.xlu0 (!%p281_p10), %v908_v3  ;;  %v349_v6 = vld [vmem:[%s1129_s3] sm:$0xff] (!%p281_p10)  ;;  %v356_v10 = vlaneseq (!%p281_p10)  ;;  %s322_s18 = sand.u32 (!%p281_p10), 1, %s889_s27  }
  0x13   : > { %403 = vperm.xlu1 (!%p281_p10), %812, %v348_v1   ;;  %352 = vperm.xlu0 (!%p281_p10), %810, %v348_v1   ;;  %v590_v7 = vld [vmem:[#allocation2] sm:$0x1] (!%p281_p10)  ;;  %s736_s19 = sshll.u32 (!%p281_p10), %s322_s18, 3  ;;  %s750_s20 = sshll.u32 (!%p281_p10), %s897_s29, 7 }
  0x14   : > { %v560_v8 = vld [vmem:[%s1130_s4] sm:$0xff] (!%p281_p10)  ;;  %v357_v11 = vshrl.u32 (!%p281_p10), %v356_v10, 7  ;;  %s324_s21 = scalar_lea.vmem (!%p281_p10), [#allocation3], %s736_s19  ;;  %s621_s6 = scalar_lea.sflag (!%p281_p10), [#allocation4], %s322_s18 }
  0x15   : > { %v570_v9 = vld [vmem:[%s1131_s5] sm:$0xff] (!%p281_p10)  ;;  %s637_s22 = sshll.u32 (!%p281_p10), %s324_s21, 4  ;;  %s1081_s22 = int_to_ptr.vmem [resolvable:$true] %s637_s22 }
  0x16   : > { %v1027_v12 = vsub.s32 (!%p281_p10), 0, %v357_v11  ;;  %v362_v13 = vsub.s32 (!%p281_p10), 4, %v357_v11  ;;  %v1029_v14 = vsub.s32 (!%p281_p10), 1, %v357_v11  ;;  %v386_v15 = vsub.s32 (!%p281_p10), 5, %v357_v11  ;;  %s827_s9 = scalar_lea.vmem (!%p281_p10), %s1081_s22, 128 }
  0x17   : > { %813 = vset.pattern.permute.xlu1 (!%p281_p10), %v909_v4  ;;  %811 = vset.pattern.permute.xlu0 (!%p281_p10), %v910_v5  ;;  %v1031_v17 = vsub.s32 (!%p281_p10), 2, %v357_v11  ;;  %v412_v18 = vsub.s32 (!%p281_p10), 6, %v357_v11  ;;  %v1033_v19 = vsub.s32 (!%p281_p10), 3, %v357_v11  ;;  %v438_v20 = vsub.s32 (!%p281_p10), 7, %v357_v11  ;;  %p828_p12 = scmp.ne.s32.totalorder (!%p281_p10), %s1081_s22, %s827_s9 }
  0x18   : > { %429 = vperm.xlu1 (!%p281_p10), %813, %v348_v1   ;;  %377 = vperm.xlu0 (!%p281_p10), %811, %v348_v1  }
  0x19   : > { %s327_s24 = scalar_select %p326_p11, %s897_s29, 1 }
  0x1a   : > { %p829_p13 = pnand %p828_p12, %p995_p4  ;;  %s911_s29 = smov [#allocation3]  }
  0x1b   : > { %s748_s25 = sshll.u32 %s327_s24, 3 }
  0x1c   : > { %814 = vset.pattern.permute.xlu1 %v908_v3  ;;  %483 = vperm.xlu0 %811, %v349_v6   ;;  %s333_s11 = scalar_lea.vmem %s1126_s0, %s748_s25  ;;  %s343_s17 = scalar_lea.vmem %s1127_s1, %s748_s25 }
  0x1d   : > { %456 = vperm.xlu1 %814, %v349_v6   ;;  %v346_v16 = vld [vmem:[%s333_s11] sm:$0xff]  ;;  %s1079_s25 = scalar_lea.hbm %s1133_s7, %s750_s20  ;;  %p830_p0 = pneg %p829_p13 }
  0x1e   : > { %v359_v21 = vrot.slane %v346_v16, %v1027_v12  ;;  %v363_v22 = vrot.slane %v346_v16, %v362_v13  ;;  %v383_v23 = vrot.slane %v346_v16, %v1029_v14  ;;  %v387_v24 = vrot.slane %v346_v16, %v386_v15  ;;  %v1040_v26 = vld [vmem:[%s343_s17] sm:$0xff]  ;;  %s831_s11 = sshll.u32 %s911_s29, 4  ;;  %s832_s11 = int_to_ptr.vmem [resolvable:$false] %s831_s11 }
  0x1f   : > { %v409_v27 = vrot.slane %v346_v16, %v1031_v17  ;;  %v413_v28 = vrot.slane %v346_v16, %v412_v18  ;;  %v435_v30 = vrot.slane %v346_v16, %v1033_v19  ;;  %v439_v31 = vrot.slane %v346_v16, %v438_v20  ;;  %s833_s13 = scalar_lea.vmem %s832_s11, 256  ;;  %p834_p1 = scmp.lt.s32.totalorder %s1081_s22, %s832_s11 }
  0x20   : > { %816 = vset.pattern.permute.xlu0 %v909_v4  ;;  %v369_v32 = vrot.slane %v359_v21, %v1027_v12  ;;  %v373_v33 = vrot.slane %v363_v22, %v1027_v12  ;;  %v393_v34 = vrot.slane %v383_v23, %v1029_v14  ;;  %v397_v35 = vrot.slane %v387_v24, %v1029_v14  ;;  %p835_p2 = scmp.lt.s32.totalorder %s833_s13, %s827_s9 }
  0x21   : > { %815 = vset.pattern.permute.xlu1 %v907_v2  ;;  %535 = vperm.xlu0 %816, %v349_v6   ;;  %v463_v36 = vrot.slane %v1040_v26, %v1027_v12  ;;  %v467_v37 = vrot.slane %v1040_v26, %v362_v13  ;;  %v419_v38 = vrot.slane %v409_v27, %v1031_v17 }
  0x22   : > { %509 = vperm.xlu1 %815, %v349_v6   ;;  %v423_v39 = vrot.slane %v413_v28, %v1031_v17  ;;  %v445_v40 = vrot.slane %v435_v30, %v1033_v19  ;;  %v449_v41 = vrot.slane %v439_v31, %v1033_v19  ;;  %v489_v44 = vrot.slane %v1040_v26, %v1029_v14  ;;  %p836_p3 = por %p835_p2, %p834_p1 }
  0x23   : > { %v493_v45 = vrot.slane %v1040_v26, %v386_v15  ;;  %v515_v46 = vrot.slane %v1040_v26, %v1031_v17  ;;  %v519_v47 = vrot.slane %v1040_v26, %v412_v18  ;;  %v473_v52 = vrot.slane %v463_v36, %v1027_v12 }
  0x24   : > { %v477_v53 = vrot.slane %v467_v37, %v1027_v12  ;;  %v541_v54 = vrot.slane %v1040_v26, %v1033_v19  ;;  %v545_v55 = vrot.slane %v1040_v26, %v438_v20  ;;  %v499_v60 = vrot.slane %v489_v44, %v1029_v14  ;;  %p837_p5 = pnand %p836_p3, %p830_p0 }
  0x25   : > { %818 = vset.pattern.permute.xlu0 %v908_v3  ;;  %v503_v61 = vrot.slane %v493_v45, %v1029_v14  ;;  %v525_v10 = vrot.slane %v515_v46, %v1031_v17  ;;  %v529_v11 = vrot.slane %v519_v47, %v1031_v17 }
  0x26   : > { %817 = vset.pattern.permute.xlu1 %v908_v3  ;;  %593 = vperm.xlu0 %818, %v590_v7   ;;  %v551_v6 = vrot.slane %v541_v54, %v1033_v19  ;;  %v555_v7 = vrot.slane %v545_v55, %v1033_v19 }
  0x27   : > { %563 = vperm.xlu1 %817, %v560_v8  }
  0x2b   : > { %573 = vperm.xlu1 %817, %v570_v9  }
  0x92   : > { %v404_v25 = vpop.permute.xlu1 %403  ;;  %v353_v29 = vpop.permute.xlu0 %352 }
  0x93   : > { %v374_v48 = vmul.f32 %v369_v32, %v353_v29  ;;  %v375_v49 = vmul.f32 %v373_v33, %v353_v29  ;;  %v424_v56 = vmul.f32 %v419_v38, %v404_v25  ;;  %v425_v57 = vmul.f32 %v423_v39, %v404_v25 }
  0x97   : > { %v430_v42 = vpop.permute.xlu1 %429  ;;  %v378_v43 = vpop.permute.xlu0 %377 }
  0x98   : > { %v398_v50 = vmul.f32 %v393_v34, %v378_v43  ;;  %v399_v51 = vmul.f32 %v397_v35, %v378_v43  ;;  %v450_v62 = vmul.f32 %v445_v40, %v430_v42  ;;  %v451_v63 = vmul.f32 %v449_v41, %v430_v42 }
  0x9a   : > { %v400_v58 = vadd.f32 %v398_v50, %v374_v48  ;;  %v401_v59 = vadd.f32 %v399_v51, %v375_v49 }
  0x9b   : > { %v484_v2 = vpop.permute.xlu0 %483 }
  0x9c   : > { %v426_v0 = vadd.f32 %v424_v56, %v400_v58  ;;  %v427_v1 = vadd.f32 %v425_v57, %v401_v59  ;;  %v457_v3 = vpop.permute.xlu1 %456  ;;  %v504_v13 = vmul.f32 %v499_v60, %v484_v2  ;;  %v505_v14 = vmul.f32 %v503_v61, %v484_v2 }
  0x9d   : > { %v478_v4 = vmul.f32 %v473_v52, %v457_v3  ;;  %v479_v5 = vmul.f32 %v477_v53, %v457_v3 }
  0x9e   : > { %v452_v8 = vadd.f32 %v450_v62, %v426_v0  ;;  %v453_v9 = vadd.f32 %v451_v63, %v427_v1 }
  0xa0   : > { %v480_v15 = vadd.f32 %v478_v4, %v452_v8  ;;  %v481_v16 = vadd.f32 %v479_v5, %v453_v9  ;;  %v536_v18 = vpop.permute.xlu0 %535 }
  0xa1   : > { %v510_v20 = vpop.permute.xlu1 %509  ;;  %v556_v21 = vmul.f32 %v551_v6, %v536_v18  ;;  %v557_v22 = vmul.f32 %v555_v7, %v536_v18 }
  0xa2   : > { %v506_v23 = vadd.f32 %v504_v13, %v480_v15  ;;  %v507_v24 = vadd.f32 %v505_v14, %v481_v16  ;;  %v530_v25 = vmul.f32 %v525_v10, %v510_v20  ;;  %v531_v27 = vmul.f32 %v529_v11, %v510_v20 }
  0xa4   : > { %v532_v28 = vadd.f32 %v530_v25, %v506_v23  ;;  %v533_v19 = vadd.f32 %v531_v27, %v507_v24 }
  0xa5   : > { %v594_v44 = vpop.permute.xlu0 %593 }
  0xa6   : > { %v564_v29 = vpop.permute.xlu1 %563  ;;  %v558_v30 = vadd.f32 %v556_v21, %v532_v28  ;;  %v559_v31 = vadd.f32 %v557_v22, %v533_v19  ;;  %v599_v49 = vrot.slane %v594_v44, %v1027_v12 }
  0xa8   : > { %v566_v32 = vadd.f32 %v564_v29, %v558_v30  ;;  %v567_v33 = vadd.f32 %v564_v29, %v559_v31 }
  0xaa   : > { %v568_v17 = vmax.f32 %v566_v32, 0.0  ;;  %v569_v34 = vmax.f32 %v567_v33, 0.0  ;;  %v574_v35 = vpop.permute.xlu1 %573 }
  0xac   : > { %v576_v36 = vmul.f32 %v574_v35, %v568_v17  ;;  %v577_v37 = vmul.f32 %v574_v35, %v569_v34 }
  0xae   : > { %v578_v38 = vrot.slane %v576_v36, 4  ;;  %v584_v39 = vrot.slane %v577_v37, 4 }
  0xb0   : > { %v579_v40 = vadd.f32 %v578_v38, %v576_v36  ;;  %v585_v41 = vadd.f32 %v584_v39, %v577_v37 }
  0xb2   : > { %v580_v42 = vrot.slane %v579_v40, 2  ;;  %v586_v43 = vrot.slane %v585_v41, 2 }
  0xb4   : > { %v581_v45 = vadd.f32 %v580_v42, %v579_v40  ;;  %v587_v46 = vadd.f32 %v586_v43, %v585_v41 }
  0xb6   : > { %v582_v47 = vrot.slane %v581_v45, 1  ;;  %v588_v48 = vrot.slane %v587_v46, 1 }
  0xb8   : > { %v583_v50 = vadd.f32 %v582_v47, %v581_v45  ;;  %v589_v51 = vadd.f32 %v588_v48, %v587_v46 }
  0xba   : > { %v600_v52 = vadd.f32 %v599_v49, %v583_v50  ;;  %v601_v53 = vadd.f32 %v599_v49, %v589_v51 }
  0xbc   : > { %v741_v54 = vmul.f32 -1.442695, %v600_v52  ;;  %v742_v55 = vmul.f32 -1.442695, %v601_v53 }
  0xbe   : > { %819 = vpow2.f32 %v741_v54 }
  0xbf   : > { %821 = vpow2.f32 %v742_v55 }
  0xc8   : > { %v820_v56 = vpop.eup %819 }
  0xc9   : > { %v822_v57 = vpop.eup %821  ;;  %v608_v58 = vadd.f32 1.0, %v820_v56 }
  0xca   : > { %v609_v59 = vadd.f32 1.0, %v822_v57 }
  0xcb   : > { %823 = vrcp.f32 %v608_v58 }
  0xcc   : > { %825 = vrcp.f32 %v609_v59 }
  0xd5   : > { %v824_v60 = vpop.eup %823 }
  0xd6   : > { %v826_v12 = vpop.eup %825 }
  0xd7   : > { %v616_v61 = vcombine.low %v824_v60, %v826_v12 }
  0xd9   : > { %v618_v62 = vmul.f32 %v616_v61, %v1040_v26 }
  0xdb   : > { %619 = vst [vmem:[%s324_s21] sm:$0xff] %v618_v62 }
  0xdc   : > { %840 = shalt.err (!%p837_p5)
}
  0xdd   : > { %s841_s16 = scalar_lea.hbm %s1079_s25, 128  ;;  %s845_s19 = scalar_lea.hbm %s1133_s7, 256 }
  0xde   : > { %p842_p6 = scmp.ne.s32.totalorder %s1079_s25, %s841_s16  ;;  %p846_p10 = scmp.lt.u32.totalorder %s1079_s25, %s1133_s7 }
  0xdf   : > { %p847_p11 = scmp.lt.u32.totalorder %s845_s19, %s841_s16  ;;  %p849_p13 = scmp.lt.u32.totalorder %s841_s16, %s1079_s25 }
  0xe0   : > { %p843_p7 = pnand %p842_p6, %p995_p4 }
  0xe1   : > { %p848_p12 = por %p847_p11, %p846_p10 }
  0xe2   : > { %p844_p9 = pneg %p843_p7 }
  0xe3   : > { %p850_p0 = por %p849_p13, %p848_p12 }
  0xe5   : > { %p851_p1 = pnand %p850_p0, %p844_p9 }
  0xe7   : > { %854 = shalt.err (!%p851_p1)
}
  0xe8   : > { %751 = dma.vmem_to_hbm [thread:$0]  (%p995_p4), %s1081_s22, 128, %s1079_s25, %s621_s6  }
  0xe9 PF: > { %p757_p2 = scmp.ge.s32.totalorder %s905_s8, 2  ;;  %s649_s23 = sand.u32 1, %s885_s26  }
  0xea   : > { %s650_s24 = scalar_lea.sflag [#allocation4], %s649_s23 }
  0xeb   : > { %p754_p3 = pnand %p757_p2, %p1002_p8 }
  0xed   : > { %880 = dma.done.wait (!%p754_p3), %s650_s24, 128  }
  0xee   : > { %882 = vsyncadd (!%p754_p3), %s650_s24, 4294967168  ;;  %s22_s8 = sadd.s32 1, %s905_s8   ;;  %s1136_s26 = smov %s889_s27 }
  0xef   : > { %p19_p5 = scmp.ge.s32.totalorder %s22_s8, 4   ;;  %s1137_s27 = smov %s893_s28 }
  0xf0   : > { %s1138_s28 = smov %s1008_s15  ;;  %s1139_s29 = smov %s901_s30 }
  0xf1   : > { %s1140_s30 = smov %s1142_s10  ;;  %21 = sbr.rel (!%p19_p5) target bundleno = 7 (0x7), region = 86 }
  0xf8   :  { %655 = vsyncpa [#allocation4], 1 }
  0xf9   :  { %657 = vsyncpa [#allocation4 + $0x1], 1 }

</bundles_post_ra>
